<compile_context>
chip_gen: v7x
topology: tpu7x:2x2x1
jax: 0.10.0
libtpu: 0.0.40
codegen_flags: <defaults>
</compile_context>

<pallas_src>
import math

import jax
import jax.numpy as jnp
from jax.experimental import pallas as pl
from jax.experimental.pallas import tpu as pltpu


# ----------------------------------------------------------------------------
# Kernels
# ----------------------------------------------------------------------------
def _freq_only_kernel(xf_ref, wf_ref, bf_ref, o_ref, acc_ref):
    """out = Xf @ Wf + bf.  Grid = (batch i, hidden j, K k); acc in VMEM f32."""
    k = pl.program_id(2)

    @pl.when(k == 0)
    def _init():
        # Bias folded into the accumulator init (finalize is cast+store only).
        acc_ref[...] = jnp.broadcast_to(bf_ref[...], acc_ref.shape)

    acc_ref[...] += jnp.dot(xf_ref[...], wf_ref[...],
                            preferred_element_type=jnp.float32)

    @pl.when(k == pl.num_programs(2) - 1)
    def _finalize():
        o_ref[...] = acc_ref[...].astype(o_ref.dtype)


def _freq_plus_rare_kernel(xf_ref, wf_ref, bf_ref,
                           xr_ref, wr1_ref, br1_ref, wr2_ref,
                           o_ref, acc_ref):
    """out = (Xf @ Wf + bf) + ((Xr @ Wr1 + br1) @ Wr2t).

    Freq branch is K-tiled with an f32 VMEM accumulator.  The (small) rare
    branch and the bias are folded into the k==0 accumulator init; its hidden
    activation stays in f32 through the second matmul.
    """
    k = pl.program_id(2)

    @pl.when(k == 0)
    def _init():
        h_rare = jnp.dot(xr_ref[...], wr1_ref[...],
                         preferred_element_type=jnp.float32) + br1_ref[...]
        rare_out = jnp.dot(h_rare, wr2_ref[...].astype(jnp.float32),
                           preferred_element_type=jnp.float32)
        acc_ref[...] = rare_out + bf_ref[...]

    acc_ref[...] += jnp.dot(xf_ref[...], wf_ref[...],
                            preferred_element_type=jnp.float32)

    @pl.when(k == pl.num_programs(2) - 1)
    def _finalize():
        o_ref[...] = acc_ref[...].astype(o_ref.dtype)


# ----------------------------------------------------------------------------
# Helpers: padding, VMEM budgeting, tile selection
# ----------------------------------------------------------------------------
def _round_up(x, m):
    return ((x + m - 1) // m) * m


def _pad_feature_dim(n):
    """Lane-dense padding; prefer a 512-multiple when the extra pad is cheap
    (<8%) so the K/N tile never degrades below 512 at production sizes."""
    p128 = _round_up(n, 128)
    p512 = _round_up(n, 512)
    if p512 - n <= 0.08 * n:
        return p512
    return p128


def _vmem_capacity_bytes():
    try:
        info = pltpu.get_tpu_info()
        for attr in ("vmem_capacity_bytes", "vmem_size_bytes", "vmem_bytes"):
            v = getattr(info, attr, None)
            if v:
                return int(v)
    except Exception:
        pass
    return 64 * 1024 * 1024  # conservative: v7x physical VMEM; safe everywhere


def _tile_cands(dim_p):
    """Tile candidates that exactly divide dim_p (largest first)."""
    cands = [dim_p]
    for t in (4096, 2048, 1024, 512, 256, 128):
        if t < dim_p and dim_p % t == 0:
            cands.append(t)
    return cands


def _tb_cands(bp8):
    cands = [t for t in (2048, 1024, 512, 256, 128, 64, 32, 16, 8) if t <= bp8]
    if bp8 <= 2048 and bp8 not in cands:
        cands.append(bp8)          # bp8 is already a multiple of 8
    return sorted(set(cands), reverse=True)


def _footprint_bytes(tb, tn, tk, itemsize, rare_dims):
    f = (2 * tb * tk + 2 * tk * tn + 2 * tb * tn) * itemsize   # xf, wf, out (dbl buf)
    f += 2 * tn * 4                                            # bf (f32, dbl buf)
    f += tb * tn * 4                                           # acc scratch
    if rare_dims is not None:
        dr_p, t_p = rare_dims
        f += (2 * tb * dr_p + 2 * dr_p * t_p + 2 * t_p * tn) * itemsize  # xr, wr1, wr2t
        f += 2 * t_p * 4                                                  # br1
    return f


def _select_tiles(B, df_p, h_p, itemsize, rare_dims, budget):
    """Pick (tb, tn, tk) minimizing modeled HBM traffic under the VMEM budget."""
    bp8 = _round_up(max(B, 1), 8)
    wf_bytes = df_p * h_p * itemsize
    best = None
    fallback = None
    for tb in _tb_cands(bp8):
        b_p = _round_up(bp8, tb)
        n_i = b_p // tb
        xf_bytes = b_p * df_p * itemsize
        for tn in _tile_cands(h_p):
            n_j = h_p // tn
            for tk in _tile_cands(df_p):
                fp = _footprint_bytes(tb, tn, tk, itemsize, rare_dims)
                if fallback is None or fp < fallback[0]:
                    fallback = (fp, (tb, tn, tk))
                if fp > budget:
                    continue
                resident = (tk == df_p and tn == h_p)     # Wf read from HBM once
                n_wf = 1 if resident else n_i
                n_xf = 1 if tk == df_p else n_j
                traffic = n_wf * wf_bytes + n_xf * xf_bytes
                # prefer >=2 parallel grid steps (megacore / v7x dual-TC)
                penalty = 1 if (n_i * n_j == 1 and bp8 >= 16) else 0
                score = (traffic, penalty, -tk, -tn, -tb)
                if best is None or score < best[0]:
                    best = (score, (tb, tn, tk))
    return best[1] if best is not None else fallback[1]


def _pad_cast(x, rows, cols, dtype):
    """Zero-pad + cast in one shot; no-op copy path when already aligned."""
    r, c = x.shape
    if r == rows and c == cols:
        return x if x.dtype == dtype else x.astype(dtype)
    return jnp.zeros((rows, cols), dtype).at[:r, :c].set(x.astype(dtype))


# ----------------------------------------------------------------------------
# Parameter init (Xavier-uniform, relu gain; biases 0.1) — padded + pre-transposed.
# ----------------------------------------------------------------------------
def init_sparse_input_net_params(key, *, input_size, hidden_size,
                                 input_size_freq=None, tail_hidden_size=None,
                                 dtype=jnp.bfloat16):
    if input_size_freq is None:
        input_size_freq = input_size
    assert 0 < input_size_freq <= input_size
    split = (input_size_freq, input_size - input_size_freq)

    gain = math.sqrt(2.0)  # torch.nn.init.calculate_gain('relu')

    def xavier(k, shape):
        fan_a, fan_b = shape  # xavier bound is symmetric in fan_in/fan_out
        bound = gain * math.sqrt(6.0 / (fan_a + fan_b))
        return jax.random.uniform(k, shape, jnp.float32, minval=-bound, maxval=bound)

    df_p = _pad_feature_dim(split[0])
    h_p = _pad_feature_dim(hidden_size)

    key, kf = jax.random.split(key)
    wf = xavier(kf, (split[0], hidden_size))          # SparseLinear weight is [in, out]

    params = {
        "split": split,
        "hidden": hidden_size,
        "tail_hidden": tail_hidden_size,
        "dtype": dtype,
        "Wf": jnp.zeros((df_p, h_p), dtype).at[:split[0], :hidden_size]
                 .set(wf.astype(dtype)),
        "bf": jnp.zeros((1, h_p), jnp.float32).at[0, :hidden_size].set(0.1),
    }

    if split[1] > 0:
        assert tail_hidden_size is not None and tail_hidden_size > 0
        dr_p = _round_up(split[1], 128)
        t_p = _round_up(tail_hidden_size, 128)
        key, k1, k2 = jax.random.split(key, 3)
        wr1 = xavier(k1, (split[1], tail_hidden_size))        # SparseLinear [in, out]
        # nn.Linear(tail, hidden, bias=False): torch weight is [hidden, tail];
        # store its transpose [tail, hidden] once so the kernel does a plain matmul.
        wr2t = xavier(k2, (tail_hidden_size, hidden_size))
        params["Wr1"] = jnp.zeros((dr_p, t_p), dtype).at[:split[1], :tail_hidden_size] \
                           .set(wr1.astype(dtype))
        params["br1"] = jnp.zeros((1, t_p), jnp.float32).at[0, :tail_hidden_size].set(0.1)
        params["Wr2t"] = jnp.zeros((t_p, h_p), dtype).at[:tail_hidden_size, :hidden_size] \
                            .set(wr2t.astype(dtype))
    return params


# ----------------------------------------------------------------------------
# Forward
# ----------------------------------------------------------------------------
def sparse_input_net_forward(X, params):
    """X: dense [B, input_size] view of the sparse input. Returns [B, hidden]."""
    split0, split1 = params["split"]
    hidden = params["hidden"]
    dtype = params["dtype"]
    B, D = X.shape
    assert D == split0 + split1

    df_p, h_p = params["Wf"].shape
    itemsize = jnp.dtype(dtype).itemsize
    rare_dims = params["Wr1"].shape if split1 > 0 else None

    cap = _vmem_capacity_bytes()
    budget = int(cap * 0.70)
    vmem_limit = min(int(cap * 0.90), cap - (2 << 20))

    tb, tn, tk = _select_tiles(B, df_p, h_p, itemsize, rare_dims, budget)
    b_p = _round_up(_round_up(B, 8), tb)
    grid = (b_p // tb, h_p // tn, df_p // tk)

    xf = _pad_cast(X[:, :split0], b_p, df_p, dtype)

    xf_spec = pl.BlockSpec((tb, tk), lambda i, j, k: (i, k))
    wf_spec = pl.BlockSpec((tk, tn), lambda i, j, k: (k, j))
    bf_spec = pl.BlockSpec((1, tn), lambda i, j, k: (0, j))
    out_spec = pl.BlockSpec((tb, tn), lambda i, j, k: (i, j))

    common = dict(
        out_shape=jax.ShapeDtypeStruct((b_p, h_p), dtype),
        compiler_params=pltpu.CompilerParams(
            dimension_semantics=("parallel", "parallel", "arbitrary"),
            vmem_limit_bytes=vmem_limit,
        ),
    )

    if split1 == 0:
        out = pl.pallas_call(
            _freq_only_kernel,
            grid_spec=pltpu.PrefetchScalarGridSpec(
                num_scalar_prefetch=0,
                grid=grid,
                in_specs=[xf_spec, wf_spec, bf_spec],
                out_specs=out_spec,
                scratch_shapes=[pltpu.VMEM((tb, tn), jnp.float32)],
            ),
            **common,
        )(xf, params["Wf"], params["bf"])
    else:
        dr_p, t_p = rare_dims
        xr = _pad_cast(X[:, split0:], b_p, dr_p, dtype)
        out = pl.pallas_call(
            _freq_plus_rare_kernel,
            grid_spec=pltpu.PrefetchScalarGridSpec(
                num_scalar_prefetch=0,
                grid=grid,
                in_specs=[
                    xf_spec, wf_spec, bf_spec,
                    pl.BlockSpec((tb, dr_p), lambda i, j, k: (i, 0)),
                    pl.BlockSpec((dr_p, t_p), lambda i, j, k: (0, 0)),
                    pl.BlockSpec((1, t_p), lambda i, j, k: (0, 0)),
                    pl.BlockSpec((t_p, tn), lambda i, j, k: (0, j)),
                ],
                out_specs=out_spec,
                scratch_shapes=[pltpu.VMEM((tb, tn), jnp.float32)],
            ),
            **common,
        )(xf, params["Wf"], params["bf"],
          xr, params["Wr1"], params["br1"], params["Wr2t"])

    return out[:B, :hidden]


# ----------------------------------------------------------------------------
# Pure-JAX reference (same quantized/padded parameters, f32 math).
# ----------------------------------------------------------------------------
def reference_forward(X, params):
    dtype = params["dtype"]
    split0, split1 = params["split"]
    hidden = params["hidden"]
    xq = X.astype(dtype).astype(jnp.float32)
    wf = params["Wf"].astype(jnp.float32)
    out = xq[:, :split0] @ wf[:split0, :hidden] + params["bf"][0, :hidden]
    if split1 > 0:
        tail = params["tail_hidden"]
        wr1 = params["Wr1"].astype(jnp.float32)
        wr2t = params["Wr2t"].astype(jnp.float32)
        h = xq[:, split0:] @ wr1[:split1, :tail] + params["br1"][0, :tail]
        out = out + h @ wr2t[:tail, :hidden]
    return out


# ----------------------------------------------------------------------------
# Demo / self-check
# ----------------------------------------------------------------------------
if __name__ == "__main__":
    key = jax.random.PRNGKey(0)

    # --- Case 1: full module (freq + rare branches), f32 storage, odd sizes ---
    input_size, input_size_freq = 200, 136
    tail_hidden_size, hidden_size = 24, 48
    batch = 16

    key, kx, km = jax.random.split(key, 3)
    X = (jax.random.normal(kx, (batch, input_size), jnp.float32)
         * jax.random.bernoulli(km, 0.1, (batch, input_size)).astype(jnp.float32))

    params_f32 = init_sparse_input_net_params(
        jax.random.PRNGKey(1), input_size=input_size, hidden_size=hidden_size,
        input_size_freq=input_size_freq, tail_hidden_size=tail_hidden_size,
        dtype=jnp.float32)
    out = jax.block_until_ready(sparse_input_net_forward(X, params_f32))
    ref = reference_forward(X, params_f32)
    assert out.shape == (batch, hidden_size)
    assert jnp.allclose(out, ref, atol=1e-4, rtol=1e-4), "f32 mismatch"

    # --- Case 2: same module with default bf16 storage (f32 accumulation) ---
    params_bf16 = init_sparse_input_net_params(
        jax.random.PRNGKey(1), input_size=input_size, hidden_size=hidden_size,
        input_size_freq=input_size_freq, tail_hidden_size=tail_hidden_size)
    out_bf16 = jax.block_until_ready(sparse_input_net_forward(X, params_bf16))
    ref_bf16 = reference_forward(X, params_bf16)
    assert jnp.allclose(out_bf16.astype(jnp.float32), ref_bf16,
                        atol=2.5e-2, rtol=2.5e-2), "bf16 mismatch"

    # --- Case 3: input_size_freq == input_size (no rare branch) ---
    params_fo = init_sparse_input_net_params(
        jax.random.PRNGKey(2), input_size=96, hidden_size=40,
        input_size_freq=None, tail_hidden_size=None, dtype=jnp.float32)
    key, kx2 = jax.random.split(key)
    X2 = jax.random.normal(kx2, (8, 96), jnp.float32)
    out2 = jax.block_until_ready(sparse_input_net_forward(X2, params_fo))
    ref2 = reference_forward(X2, params_fo)
    assert out2.shape == (8, 40)
    assert jnp.allclose(out2, ref2, atol=1e-4, rtol=1e-4), "freq-only mismatch"

    print("KERNEL_OK")
</pallas_src>

<mosaic_0001>
module attributes {stable_mosaic.version = 11 : i64} {
  func.func @_freq_plus_rare_kernel(%arg0: i32, %arg1: i32, %arg2: i32, %arg3: memref<8x256xf32, #tpu.memory_space<vmem>>, %arg4: memref<256x128xf32, #tpu.memory_space<vmem>>, %arg5: memref<1x128xf32, #tpu.memory_space<vmem>>, %arg6: memref<8x128xf32, #tpu.memory_space<vmem>>, %arg7: memref<128x128xf32, #tpu.memory_space<vmem>>, %arg8: memref<1x128xf32, #tpu.memory_space<vmem>>, %arg9: memref<128x128xf32, #tpu.memory_space<vmem>>, %arg10: memref<8x128xf32, #tpu.memory_space<vmem>>, %arg11: memref<8x128xf32, #tpu.memory_space<vmem>>) attributes {dimension_semantics = [#tpu.dimension_semantics<parallel>, #tpu.dimension_semantics<parallel>, #tpu.dimension_semantics<arbitrary>], iteration_bounds = array<i64: 2, 1, 1>, scalar_prefetch = 0 : i64, scratch_operands = 1 : i64, tpu.core_type = #tpu.core_type<tc>, window_params = [{transform_indices = @transform_0, window_bounds = array<i64: 8, 256>}, {transform_indices = @transform_1, window_bounds = array<i64: 256, 128>}, {transform_indices = @transform_2, window_bounds = array<i64: 1, 128>}, {transform_indices = @transform_3, window_bounds = array<i64: 8, 128>}, {pipeline_mode = #tpu.pipeline_mode<synchronous>, transform_indices = @transform_4, window_bounds = array<i64: 128, 128>}, {pipeline_mode = #tpu.pipeline_mode<synchronous>, transform_indices = @transform_5, window_bounds = array<i64: 1, 128>}, {transform_indices = @transform_6, window_bounds = array<i64: 128, 128>}, {transform_indices = @transform_7, window_bounds = array<i64: 8, 128>}]} {
    %c0_i32 = arith.constant 0 : i32
    %0 = arith.cmpi eq, %arg2, %c0_i32 : i32
    %1 = arith.extui %0 : i1 to i32
    %c0_i32_0 = arith.constant 0 : i32
    %2 = arith.cmpi ne, %1, %c0_i32_0 : i32
    scf.if %2 {
      %c0_10 = arith.constant 0 : index
      %c0_11 = arith.constant 0 : index
      %12 = vector.load %arg6[%c0_10, %c0_11] : memref<8x128xf32, #tpu.memory_space<vmem>>, vector<8x128xf32>
      %c0_12 = arith.constant 0 : index
      %c0_13 = arith.constant 0 : index
      %13 = vector.load %arg7[%c0_12, %c0_13] : memref<128x128xf32, #tpu.memory_space<vmem>>, vector<128x128xf32>
      %cst_14 = arith.constant dense<0.000000e+00> : vector<8x128xf32>
      %14 = tpu.matmul %12, %13, %cst_14 {dimension_numbers = #tpu.dot_dimension_numbers<[1], [0], [0], [1], [0, 0, 1, 1], [], []>} : vector<8x128xf32>, vector<128x128xf32>, vector<8x128xf32> -> vector<8x128xf32>
      %c0_15 = arith.constant 0 : index
      %c0_16 = arith.constant 0 : index
      %15 = vector.load %arg8[%c0_15, %c0_16] : memref<1x128xf32, #tpu.memory_space<vmem>>, vector<1x128xf32>
      %16 = vector.broadcast %15 : vector<1x128xf32> to vector<8x128xf32>
      %17 = arith.addf %14, %16 : vector<8x128xf32>
      %c0_17 = arith.constant 0 : index
      %c0_18 = arith.constant 0 : index
      %18 = vector.load %arg9[%c0_17, %c0_18] : memref<128x128xf32, #tpu.memory_space<vmem>>, vector<128x128xf32>
      %cst_19 = arith.constant dense<0.000000e+00> : vector<8x128xf32>
      %19 = tpu.matmul %17, %18, %cst_19 {dimension_numbers = #tpu.dot_dimension_numbers<[1], [0], [0], [1], [0, 0, 1, 1], [], []>} : vector<8x128xf32>, vector<128x128xf32>, vector<8x128xf32> -> vector<8x128xf32>
      %c0_20 = arith.constant 0 : index
      %c0_21 = arith.constant 0 : index
      %20 = vector.load %arg5[%c0_20, %c0_21] : memref<1x128xf32, #tpu.memory_space<vmem>>, vector<1x128xf32>
      %21 = vector.broadcast %20 : vector<1x128xf32> to vector<8x128xf32>
      %22 = arith.addf %19, %21 : vector<8x128xf32>
      %c0_22 = arith.constant 0 : index
      %c0_23 = arith.constant 0 : index
      %23 = vector.load %arg11[%c0_22, %c0_23] : memref<8x128xf32, #tpu.memory_space<vmem>>, vector<8x128xf32>
      tpu.vector_store %arg11[%c0_22, %c0_23], %22 {strides = array<i32>} : memref<8x128xf32, #tpu.memory_space<vmem>>, vector<8x128xf32>,
    } else {
    }
    %c0 = arith.constant 0 : index
    %c0_1 = arith.constant 0 : index
    %3 = vector.load %arg11[%c0, %c0_1] : memref<8x128xf32, #tpu.memory_space<vmem>>, vector<8x128xf32>
    %c0_2 = arith.constant 0 : index
    %c0_3 = arith.constant 0 : index
    %4 = vector.load %arg3[%c0_2, %c0_3] : memref<8x256xf32, #tpu.memory_space<vmem>>, vector<8x256xf32>
    %c0_4 = arith.constant 0 : index
    %c0_5 = arith.constant 0 : index
    %5 = vector.load %arg4[%c0_4, %c0_5] : memref<256x128xf32, #tpu.memory_space<vmem>>, vector<256x128xf32>
    %cst = arith.constant dense<0.000000e+00> : vector<8x128xf32>
    %6 = tpu.matmul %4, %5, %cst {dimension_numbers = #tpu.dot_dimension_numbers<[1], [0], [0], [1], [0, 0, 1, 1], [], []>} : vector<8x256xf32>, vector<256x128xf32>, vector<8x128xf32> -> vector<8x128xf32>
    %7 = arith.addf %3, %6 : vector<8x128xf32>
    %c0_6 = arith.constant 0 : index
    %c0_7 = arith.constant 0 : index
    %8 = vector.load %arg11[%c0_6, %c0_7] : memref<8x128xf32, #tpu.memory_space<vmem>>, vector<8x128xf32>
    tpu.vector_store %arg11[%c0_6, %c0_7], %7 {strides = array<i32>} : memref<8x128xf32, #tpu.memory_space<vmem>>, vector<8x128xf32>,
    %c0_i32_8 = arith.constant 0 : i32
    %9 = arith.cmpi eq, %arg2, %c0_i32_8 : i32
    %10 = arith.extui %9 : i1 to i32
    %c0_i32_9 = arith.constant 0 : i32
    %11 = arith.cmpi ne, %10, %c0_i32_9 : i32
    scf.if %11 {
      %c0_10 = arith.constant 0 : index
      %c0_11 = arith.constant 0 : index
      %12 = vector.load %arg11[%c0_10, %c0_11] : memref<8x128xf32, #tpu.memory_space<vmem>>, vector<8x128xf32>
      %c0_12 = arith.constant 0 : index
      %c0_13 = arith.constant 0 : index
      %13 = vector.load %arg10[%c0_12, %c0_13] : memref<8x128xf32, #tpu.memory_space<vmem>>, vector<8x128xf32>
      tpu.vector_store %arg10[%c0_12, %c0_13], %12 {strides = array<i32>} : memref<8x128xf32, #tpu.memory_space<vmem>>, vector<8x128xf32>,
    } else {
    }
    return
  }
  func.func @transform_0(%arg0: i32, %arg1: i32, %arg2: i32) -> (i32, i32) {
    %c0_i32 = arith.constant 0 : i32
    return %arg0, %arg2 : i32, i32
  }
  func.func @transform_1(%arg0: i32, %arg1: i32, %arg2: i32) -> (i32, i32) {
    %c0_i32 = arith.constant 0 : i32
    return %arg2, %arg1 : i32, i32
  }
  func.func @transform_2(%arg0: i32, %arg1: i32, %arg2: i32) -> (i32, i32) {
    %c0_i32 = arith.constant 0 : i32
    %c0_i32_0 = arith.constant 0 : i32
    return %c0_i32, %arg1 : i32, i32
  }
  func.func @transform_3(%arg0: i32, %arg1: i32, %arg2: i32) -> (i32, i32) {
    %c0_i32 = arith.constant 0 : i32
    %c0_i32_0 = arith.constant 0 : i32
    return %arg0, %c0_i32 : i32, i32
  }
  func.func @transform_4(%arg0: i32, %arg1: i32, %arg2: i32) -> (i32, i32) {
    %c0_i32 = arith.constant 0 : i32
    %c0_i32_0 = arith.constant 0 : i32
    %c0_i32_1 = arith.constant 0 : i32
    return %c0_i32, %c0_i32_0 : i32, i32
  }
  func.func @transform_5(%arg0: i32, %arg1: i32, %arg2: i32) -> (i32, i32) {
    %c0_i32 = arith.constant 0 : i32
    %c0_i32_0 = arith.constant 0 : i32
    %c0_i32_1 = arith.constant 0 : i32
    return %c0_i32, %c0_i32_0 : i32, i32
  }
  func.func @transform_6(%arg0: i32, %arg1: i32, %arg2: i32) -> (i32, i32) {
    %c0_i32 = arith.constant 0 : i32
    %c0_i32_0 = arith.constant 0 : i32
    return %c0_i32, %arg1 : i32, i32
  }
  func.func @transform_7(%arg0: i32, %arg1: i32, %arg2: i32) -> (i32, i32) {
    %c0_i32 = arith.constant 0 : i32
    return %arg0, %arg1 : i32, i32
  }
}

</mosaic_0001>

<bundles_post_ra>
// kernel: tpu_custom_call.1
= control target key start
LH: loop header
LB: loop body
LE: loop exit
PB: predicated region body
PF: predicated region fallthrough
CT: control target
= control target key end

     0   :  { %s1882_s0 = inlined_call_operand.hbm [shape: f32[16,256], index: 0, kind: input, shape index: {}]   ;;  %s1883_s1 = inlined_call_operand.hbm [shape: f32[256,128], index: 1, kind: input, shape index: {}]   ;;  %s1884_s2 = inlined_call_operand.vmem [shape: f32[1,128], index: 2, kind: input, shape index: {}]   ;;  %s1885_s3 = inlined_call_operand.hbm [shape: f32[16,128], index: 3, kind: input, shape index: {}]   ;;  %s1886_s4 = inlined_call_operand.hbm [shape: f32[128,128], index: 4, kind: input, shape index: {}]   ;;  %s1887_s5 = inlined_call_operand.vmem [shape: f32[1,128], index: 5, kind: input, shape index: {}]   ;;  %s1888_s6 = inlined_call_operand.hbm [shape: f32[128,128], index: 6, kind: input, shape index: {}]   ;;  %s1889_s7 = inlined_call_operand.hbm [shape: f32[16,128], index: 7, kind: output, shape index: {}]  }
   0x1   :  { %1908 = sst [smem:[#allocation24_spill]] %s1882_s0 }
   0x2   :  { %1909 = sst [smem:[#allocation25_spill]] %s1883_s1 }
   0x3   :  { %1910 = sst [smem:[#allocation26_spill]] %s1889_s7 }
   0x4   :  { %12 = vsyncpa [#allocation4], 0 }
   0x5   :  { %14 = vsyncpa [#allocation4 + $0x1], 0 }
   0x6   :  { %15 = vsyncpa [#allocation7], 0 }
   0x7   :  { %16 = vsyncpa [#allocation11], 0 }
   0x8   :  { %17 = vsyncpa [#allocation5], 0 }
   0x9   :  { %19 = vsyncpa [#allocation5 + $0x1], 0  ;;  %s1547_s24 = smov 0   ;;  %s1549_s25 = smov 0  }
   0xa   :  { %s1551_s26 = smov 0   ;;  %s1553_s27 = smov 0  }
   0xb   :  { %s1555_s28 = smov 0   ;;  %s1557_s29 = smov 0  }
   0xc LB: > { %1911 = sst [smem:[#allocation19_spill]] %s1474_s24  ;;  %s1578_s30 = sadd.s32 4294967295, %s1494_s29   ;;  %s1494_s29 = sphi %s1557_s29, %s25_s29   ;;  %s1490_s28 = sphi %s1555_s28, %s1953_s28   ;;  %s1486_s27 = sphi %s1553_s27, %s1952_s27   ;;  %s1482_s26 = sphi %s1551_s26, %s1948_s26   ;;  %s1478_s25 = sphi %s1549_s25, %s1951_s25   ;;  %s1474_s24 = sphi %s1547_s24, %s1950_s24  }
   0xd   : > { %1912 = sst [smem:[#allocation20_spill]] %s1482_s26  ;;  %s904_s8 = sadd.s32 4294967294, %s1494_s29  }
   0xe   : > { %p66_p0 = scmp.ne.s32.totalorder %s1478_s25, %s1474_s24  ;;  %p1890_p1 = scmp.eq.s32.totalorder %s1578_s30, 0 }
   0xf   : > { %p246_p3 = scmp.eq.s32.totalorder %s904_s8, 1  ;;  %p905_p5 = scmp.ge.s32.totalorder %s1494_s29, 1 }
  0x10   : > { %p1587_p4 = por %p1890_p1, %p66_p0  ;;  %p253_p7 = scmp.lt.s32.totalorder %s1494_s29, 3 }
  0x11   : > { %p1592_p6 = por %p246_p3, %p66_p0  ;;  %s1496_s12 = smov [#allocation6]  }
  0x12   : > { %s1913_s9 = scalar_select %p1587_p4, 1, 0 }
  0x13   : > { %s1914_s10 = scalar_select %p1592_p6, 1, 0 }
  0x14   : > { %p1597_p8 = pnand %p905_p5, %p253_p7  ;;  %s269_s13 = sshll.u32 %s1496_s12, 4  ;;  %s270_s13 = int_to_ptr.vmem [resolvable:$true] %s269_s13 }
  0x15   : > { %1915 = sst [smem:[#allocation21_spill]] %s1914_s10  ;;  %s44_s15 = sadd.s32 1, %s1490_s28 }
  0x16   : > { %s1916_s11 = scalar_select %p1597_p8, 1, 0 }
  0x17   : > { %p1167_p9 = pneg %p1597_p8  ;;  %s1918_s1 = sld [smem:[#allocation25_spill]] }
  0x19   : > { %p1606_p11 = pnand %p1167_p9, %p1890_p1 }
  0x1b   : > { %s1917_s14 = scalar_select %p1606_p11, 1, 0 }
  0x1c   : > { %p1619_p13 = pneg %p1606_p11 }
  0x1d   : > { %s1252_s18 = scalar_lea.hbm %s1918_s1, 4096 }
  0x1e   : > { %p1253_p12 = scmp.ne.s32.totalorder %s1918_s1, %s1252_s18  ;;  %p1259_p5 = scmp.lt.u32.totalorder %s1252_s18, %s1918_s1 }
  0x20   : > { %p1255_p0 = pnand %p1619_p13, %p1253_p12 }
  0x22   : > { %p1256_p3 = pneg %p1255_p0 }
  0x24   : > { %p1261_p7 = pnand %p1259_p5, %p1256_p3 }
  0x26   : > { %1264 = shalt.err (!%p1261_p7)
}
  0x27   : > { %s1265_s8 = scalar_lea.vmem %s270_s13, 4096  ;;  %p1273_p2 = scmp.lt.s32.totalorder %s270_s13, %s270_s13 }
  0x28   : > { %p1266_p9 = scmp.ne.s32.totalorder %s270_s13, %s1265_s8  ;;  %p1274_p6 = scmp.lt.s32.totalorder %s1265_s8, %s1265_s8 }
  0x2a   : > { %p1268_p10 = pnand %p1266_p9, %p1619_p13  ;;  %p1275_p4 = por %p1274_p6, %p1273_p2 }
  0x2c   : > { %p1269_p1 = pneg %p1268_p10 }
  0x2e   : > { %p1276_p8 = pnand %p1275_p4, %p1269_p1 }
  0x30   : > { %1279 = shalt.err (!%p1276_p8)
}
  0x31   : > { %s1893_s12 = smov 128   ;;  %s1895_s16 = smov 8  }
  0x32   : > { %1170 = dma.hbm_to_vmem [thread:$0]  (!%p1606_p11), %s1918_s1, 4096, %s270_s13, [#allocation7], %s1893_s12, %s1893_s12, %s1895_s16  }
  0x33   : > { %p46_p1 = scmp.ge.s32.totalorder %s44_s15, 2  ;;  %s53_s19 = sadd.s32 1, %s1482_s26 }
  0x34   : > { %p60_p2 = scmp.ne.s32.totalorder %s1482_s26, %s1478_s25  ;;  %p61_p4 = scmp.eq.s32.totalorder %s1494_s29, 0 }
  0x35   : > { %s1955_s15 = smov (%p46_p1, %s44_s15), 0  ;;  %p1922_p8 = scmp.eq.s32.totalorder %s1578_s30, 1 }
  0x36   : > { %1920 = sst [smem:[#allocation22_spill]] %s1955_s15  ;;  %p1644_p6 = por %p61_p4, %p60_p2 }
  0x37   : > { %p1650_p10 = por %p1922_p8, %p60_p2  ;;  %s48_s23 = ssub.s32 %s1490_s28, %s1955_s15 }
  0x38   : > { %p1191_p12 = scmp.lt.s32.totalorder %s1494_s29, 2  ;;  %p51_p0 = scmp.eq.s32.totalorder %s48_s23, 0 }
  0x39   : > { %s1923_s22 = scalar_select %p1650_p10, 1, 0 }
  0x3a   : > { %s320_s13 = sand.u32 1, %s1494_s29   ;;  %s322_s8 = sand.u32 1, %s1482_s26  }
  0x3b   : > { %s1660_s17 = scalar_select %p51_p0, %s1482_s26, %s53_s19  }
  0x3c   : > { %s911_s18 = sshll.u32 %s322_s8, 4  ;;  %s929_s12 = sshll.u32 %s1490_s28, 8 }
  0x3d   : > { %1924 = sst [smem:[#allocation23_spill]] %s1660_s17  ;;  %s1925_s0 = sld [smem:[#allocation24_spill]] }
  0x3e   : > { %s324_s24 = scalar_lea.vmem [#allocation3], %s911_s18  ;;  %p1670_p3 = pnand %p1191_p12, %p1644_p6 }
  0x3f   : > { %s334_s7 = sshll.u32 %s324_s24, 4  ;;  %s1676_s19 = sshll.u32 %s322_s8, 3  ;;  %s1674_s7 = int_to_ptr.vmem [resolvable:$true] %s334_s7 }
  0x40   : > { %s1926_s23 = scalar_select %p1670_p3, 1, 0 }
  0x41   : > { %s1678_s1 = scalar_lea.sflag [#allocation4], %s320_s13  ;;  %p1905_p7 = pneg %p1670_p3 }
  0x43   : > { %s1666_s10 = scalar_lea.hbm %s1925_s0, %s929_s12  ;;  %s1285_s20 = scalar_lea.hbm %s1925_s0, 512 }
  0x44   : > { %s1280_s12 = scalar_lea.hbm %s1666_s10, 256  ;;  %p1286_p2 = scmp.lt.u32.totalorder %s1666_s10, %s1925_s0 }
  0x45   : > { %p1281_p5 = scmp.ne.s32.totalorder %s1666_s10, %s1280_s12  ;;  %p1287_p4 = scmp.lt.u32.totalorder %s1285_s20, %s1280_s12 }
  0x46   : > { %p1289_p8 = scmp.lt.u32.totalorder %s1280_s12, %s1666_s10 }
  0x47   : > { %p1283_p9 = pnand %p1905_p7, %p1281_p5  ;;  %p1288_p6 = por %p1287_p4, %p1286_p2 }
  0x49   : > { %p1284_p1 = pneg %p1283_p9  ;;  %p1290_p12 = por %p1289_p8, %p1288_p6 }
  0x4b   : > { %p1291_p0 = pnand %p1290_p12, %p1284_p1 }
  0x4d   : > { %1294 = shalt.err (!%p1291_p0)
}
  0x4e   : > { %s1295_s13 = scalar_lea.vmem %s1674_s7, 256  ;;  %s1499_s8 = smov [#allocation3]  }
  0x4f   : > { %p1296_p5 = scmp.ne.s32.totalorder %s1674_s7, %s1295_s13  ;;  %s1300_s24 = sshll.u32 %s1499_s8, 4  ;;  %s1301_s24 = int_to_ptr.vmem [resolvable:$false] %s1300_s24 }
  0x50   : > { %s1302_s15 = scalar_lea.vmem %s1301_s24, 512  ;;  %p1303_p11 = scmp.lt.s32.totalorder %s1674_s7, %s1301_s24 }
  0x51   : > { %p1298_p9 = pnand %p1296_p5, %p1905_p7  ;;  %p1304_p2 = scmp.lt.s32.totalorder %s1302_s15, %s1295_s13 }
  0x53   : > { %p1299_p10 = pneg %p1298_p9  ;;  %p1305_p4 = por %p1304_p2, %p1303_p11 }
  0x55   : > { %p1306_p6 = pnand %p1305_p4, %p1299_p10 }
  0x57   : > { %1309 = shalt.err (!%p1306_p6)
}
  0x58   : > { %1180 = dma.hbm_to_vmem [thread:$0]  (!%p1670_p3), %s1666_s10, 256, %s1674_s7, %s1678_s1  }
  0x59   : > { %s1500_s12 = smov [#allocation9]   ;;  %s1501_s20 = smov [#allocation10]  }
  0x5a   : > { %s288_s16 = sshll.u32 %s1500_s12, 4  ;;  %s306_s18 = sshll.u32 %s1501_s20, 4  ;;  %s289_s16 = int_to_ptr.vmem [resolvable:$true] %s288_s16  ;;  %s307_s18 = int_to_ptr.vmem [resolvable:$true] %s306_s18 }
  0x5b   : > { %s1310_s24 = scalar_lea.hbm %s1886_s4, 2048 }
  0x5c   : > { %p1311_p11 = scmp.ne.s32.totalorder %s1886_s4, %s1310_s24  ;;  %p1317_p8 = scmp.lt.u32.totalorder %s1310_s24, %s1886_s4 }
  0x5e   : > { %p1313_p10 = pnand %p1311_p11, %p1619_p13 }
  0x60   : > { %p1314_p1 = pneg %p1313_p10 }
  0x62   : > { %p1319_p12 = pnand %p1317_p8, %p1314_p1 }
  0x64   : > { %1322 = shalt.err (!%p1319_p12)
}
  0x65   : > { %s1323_s7 = scalar_lea.vmem %s289_s16, 2048  ;;  %p1331_p2 = scmp.lt.s32.totalorder %s289_s16, %s289_s16 }
  0x66   : > { %p1324_p0 = scmp.ne.s32.totalorder %s289_s16, %s1323_s7  ;;  %p1332_p4 = scmp.lt.s32.totalorder %s1323_s7, %s1323_s7 }
  0x68   : > { %p1326_p5 = pnand %p1324_p0, %p1619_p13  ;;  %p1333_p6 = por %p1332_p4, %p1331_p2 }
  0x6a   : > { %p1327_p9 = pneg %p1326_p5 }
  0x6c   : > { %p1334_p7 = pnand %p1333_p6, %p1327_p9 }
  0x6e   : > { %1337 = shalt.err (!%p1334_p7)
}
  0x6f   : > { %p1927_p11 = scmp.ne.s32.totalorder %s1917_s14, 0  ;;  %s1928_s0 = smov 8  }
  0x70   : > { %s1929_s10 = smov 128   ;;  %s1338_s8 = scalar_lea.hbm %s1888_s6, 2048 }
  0x71   : > { %1173 = dma.hbm_to_vmem [thread:$0]  (!%p1927_p11), %s1886_s4, 2048, %s289_s16, [#allocation7], %s1929_s10, %s1929_s10, %s1928_s0  }
  0x72   : > { %p1339_p10 = scmp.ne.s32.totalorder %s1888_s6, %s1338_s8  ;;  %p1345_p8 = scmp.lt.u32.totalorder %s1338_s8, %s1888_s6 }
  0x74   : > { %p1341_p7 = pnand %p1339_p10, %p1619_p13 }
  0x76   : > { %p1342_p1 = pneg %p1341_p7 }
  0x78   : > { %p1347_p12 = pnand %p1345_p8, %p1342_p1 }
  0x7a   : > { %1350 = shalt.err (!%p1347_p12)
}
  0x7b   : > { %s1351_s26 = scalar_lea.vmem %s307_s18, 2048  ;;  %p1359_p2 = scmp.lt.s32.totalorder %s307_s18, %s307_s18 }
  0x7c   : > { %p1352_p0 = scmp.ne.s32.totalorder %s307_s18, %s1351_s26  ;;  %p1360_p4 = scmp.lt.s32.totalorder %s1351_s26, %s1351_s26 }
  0x7e   : > { %p1354_p5 = pnand %p1352_p0, %p1619_p13  ;;  %p1361_p6 = por %p1360_p4, %p1359_p2 }
  0x80   : > { %p1355_p9 = pneg %p1354_p5 }
  0x82   : > { %p1362_p3 = pnand %p1361_p6, %p1355_p9 }
  0x84   : > { %1365 = shalt.err (!%p1362_p3)
}
  0x85   : > { %1176 = dma.hbm_to_vmem [thread:$0]  (!%p1927_p11), %s1888_s6, 2048, %s307_s18, [#allocation11], %s1929_s10, %s1929_s10, %s1928_s0  }
  0x86   : > { %s915_s21 = sshll.u32 %s1490_s28, 7  ;;  %s345_s12 = scalar_lea.vmem [#allocation8], %s1676_s19 }
  0x87   : > { %s352_s20 = sshll.u32 %s345_s12, 4  ;;  %s350_s13 = scalar_lea.hbm %s1885_s3, %s915_s21  ;;  %s353_s20 = int_to_ptr.vmem [resolvable:$true] %s352_s20 }
  0x88   : > { %s1366_s15 = scalar_lea.hbm %s350_s13, 128  ;;  %p1930_p3 = scmp.ne.s32.totalorder %s1926_s23, 0 }
  0x89   : > { %p1367_p13 = scmp.ne.s32.totalorder %s350_s13, %s1366_s15  ;;  %s1371_s26 = scalar_lea.hbm %s1885_s3, 256 }
  0x8a   : > { %p1931_p10 = pneg %p1930_p3  ;;  %p1372_p11 = scmp.lt.u32.totalorder %s350_s13, %s1885_s3 }
  0x8b   : > { %p1373_p8 = scmp.lt.u32.totalorder %s1371_s26, %s1366_s15  ;;  %p1375_p0 = scmp.lt.u32.totalorder %s1366_s15, %s350_s13 }
  0x8c   : > { %p1369_p7 = pnand %p1367_p13, %p1931_p10 }
  0x8d   : > { %p1374_p12 = por %p1373_p8, %p1372_p11 }
  0x8e   : > { %p1370_p1 = pneg %p1369_p7 }
  0x8f   : > { %p1376_p5 = por %p1375_p0, %p1374_p12 }
  0x91   : > { %p1377_p9 = pnand %p1376_p5, %p1370_p1 }
  0x93   : > { %1380 = shalt.err (!%p1377_p9)
}
  0x94   : > { %s1381_s19 = scalar_lea.vmem %s353_s20, 128  ;;  %p1932_p4 = pmov %p1931_p10 }
  0x95   : > { %p1382_p2 = scmp.ne.s32.totalorder %s353_s20, %s1381_s19  ;;  %s1502_s0 = smov [#allocation8]  }
  0x96   : > { %s1386_s10 = sshll.u32 %s1502_s0, 4  ;;  %s1387_s10 = int_to_ptr.vmem [resolvable:$false] %s1386_s10 }
  0x97   : > { %p1384_p6 = pnand %p1382_p2, %p1932_p4  ;;  %s1388_s17 = scalar_lea.vmem %s1387_s10, 256 }
  0x98   : > { %p1389_p10 = scmp.lt.s32.totalorder %s353_s20, %s1387_s10  ;;  %p1390_p7 = scmp.lt.s32.totalorder %s1388_s17, %s1381_s19 }
  0x99   : > { %p1385_p13 = pneg %p1384_p6 }
  0x9a   : > { %p1391_p8 = por %p1390_p7, %p1389_p10 }
  0x9c   : > { %p1392_p11 = pnand %p1391_p8, %p1385_p13 }
  0x9e   : > { %1395 = shalt.err (!%p1392_p11)
}
  0x9f   : > { %1183 = dma.hbm_to_vmem [thread:$0]  (!%p1930_p3), %s350_s13, 128, %s353_s20, %s1678_s1  }
  0xa0   : > { %p1933_p1 = scmp.ne.s32.totalorder %s1916_s11, 0 }
  0xa1   : > { %s363_s21 = sand.u32 (!%p1933_p1), 1, %s1578_s30   ;;  %s1772_s12 = sand.u32 (!%p1933_p1), 1, %s1478_s25  }
  0xa2   : > { %361 = sbr.rel (%p1933_p1) target bundleno = 661 (0x295), region = 48  ;;  %s917_s8 = sshll.u32 (!%p1933_p1), %s1772_s12, 4 }
  0xa3   : > { %s364_s24 = scalar_lea.sflag (!%p1933_p1), [#allocation4], %s363_s21  ;;  %s1775_s15 = scalar_lea.vmem (!%p1933_p1), [#allocation3], %s917_s8 }
  0xa4   : > { %p1934_p12 = scmp.ne.s32.totalorder (!%p1933_p1), %s1913_s9, 0 }
  0xa9   : > { %1449 = dma.done.wait (%p1934_p12), %s364_s24, 256  }
  0xaa   : > { %1451 = vsyncadd (%p1934_p12), %s364_s24, 4294967040  ;;  %p1935_p3 = scmp.eq.s32.totalorder %s1578_s30, 0 }
  0xac   : > { %1453 = dma.done.wait (%p1935_p3), [#allocation7], 4096   ;;  %p1936_p0 = pmov %p1935_p3 }
  0xad   : > { %s919_s11 = sshll.u32 %s1772_s12, 3 }
  0xae   : > { %1455 = vsyncadd (%p1936_p0), [#allocation7], 4294963200  ;;  %s1788_s23 = scalar_lea.vmem [#allocation8], %s919_s11 }
  0xaf   : > { %1457 = dma.done.wait (%p1934_p12), %s364_s24, 128  }
  0xb0   : > { %1459 = vsyncadd (%p1934_p12), %s364_s24, 4294967168  ;;  %p1937_p5 = pmov %p1936_p0 }
  0xb1   : > { %p1938_p9 = pmov %p1936_p0 }
  0xb2   : > { %1461 = dma.done.wait (%p1937_p5), [#allocation7], 2048  }
  0xb3   : > { %1463 = vsyncadd (%p1938_p9), [#allocation7], 4294965248  ;;  %p1939_p2 = pmov %p1936_p0 }
  0xb4   : > { %p1940_p4 = pmov %p1936_p0 }
  0xb5   : > { %1465 = dma.done.wait (%p1939_p2), [#allocation11], 2048  }
  0xb6   : > { %1467 = vsyncadd (%p1940_p4), [#allocation11], 4294965248  ;;  %v1503_v0 = vmov 0.0|0.0   ;;  %vm1504_vm0 = vmmov 0   ;;  %v1505_v1 = vmov 0.0   ;;  %v437_v2 = vld [vmem:[#allocation9] sm:$0xff] }
  0xb7   : > { %1069 = vmatprep.subr.bf16.mxu0 %v1503_v0  ;;  %1031 = vmatprep.mubr.msk.f32.mxu0 %vm1504_vm0, %v1505_v1  ;;  %v438_v3 = vld [vmem:[#allocation9 + $0x8] sm:$0xff]  ;;  %v439_v4 = vld [vmem:[#allocation9 + $0x10] sm:$0xff]  ;;  %v440_v6 = vld [vmem:[#allocation9 + $0x18] sm:$0xff]  ;;  %s926_s13 = sshll.u32 %s1486_s27, 7  ;;  %s426_s14 = scalar_lea.vmem [#allocation12], %s919_s11 }
  0xb8   : > { %1093 = vmatprep.subr.bf16.mxu1 %v1503_v0  ;;  %1066 = vmatprep.mubr.msk.f32.mxu1 %vm1504_vm0, %v1505_v1  ;;  %v1070_v5 = vpack.c.bf16 %v438_v3, %v437_v2  ;;  %v1073_v7 = vpack.c.bf16 %v440_v6, %v439_v4  ;;  %v441_v8 = vld [vmem:[#allocation9 + $0x20] sm:$0xff]  ;;  %v442_v9 = vld [vmem:[#allocation9 + $0x28] sm:$0xff]  ;;  %v443_v13 = vld [vmem:[#allocation9 + $0x30] sm:$0xff]  ;;  %s751_s7 = sshll.u32 %s426_s14, 4  ;;  %s1941_s18 = sld [smem:[#allocation26_spill]]  ;;  %s1835_s7 = int_to_ptr.vmem [resolvable:$true] %s751_s7 }
  0xb9   : > { %v1076_v10 = vpack.c.bf16 %v442_v9, %v441_v8  ;;  %v530_v11 = vld [vmem:[#allocation10] sm:$0xff]  ;;  %v531_v12 = vld [vmem:[#allocation10 + $0x8] sm:$0xff]  ;;  %v444_v14 = vld [vmem:[#allocation9 + $0x38] sm:$0xff]  ;;  %s737_s0 = scalar_lea.sflag [#allocation5], %s1772_s12  ;;  %s1396_s10 = scalar_lea.vmem %s1835_s7, 128 }
  0xba   : > { %1071 = vmatpush3.bf16.msra.mxu0 %v1070_v5  ;;  %v1094_v15 = vpack.c.bf16 %v531_v12, %v530_v11  ;;  %v532_v16 = vld [vmem:[#allocation10 + $0x10] sm:$0xff]  ;;  %v533_v17 = vld [vmem:[#allocation10 + $0x18] sm:$0xff]  ;;  %v1079_v19 = vpack.c.bf16 %v444_v14, %v443_v13  ;;  %v534_v20 = vld [vmem:[#allocation10 + $0x20] sm:$0xff]  ;;  %p1397_p6 = scmp.ne.s32.totalorder %s1835_s7, %s1396_s10  ;;  %p1942_p13 = scmp.ne.s32.totalorder %s1923_s22, 0 }
  0xbb   : > { %1072 = vmatprep.subr.bf16.mxu0 %v1503_v0  ;;  %v1097_v18 = vpack.c.bf16 %v533_v17, %v532_v16  ;;  %v535_v21 = vld [vmem:[#allocation10 + $0x28] sm:$0xff]  ;;  %v445_v22 = vld [vmem:[#allocation9 + $0x40] sm:$0xff]  ;;  %v536_v26 = vld [vmem:[#allocation10 + $0x30] sm:$0xff]  ;;  %s1506_s27 = smov [#allocation12]  }
  0xbc   : > { %1095 = vmatpush3.bf16.msra.mxu1 %v1094_v15  ;;  %v446_v23 = vld [vmem:[#allocation9 + $0x48] sm:$0xff]  ;;  %v1100_v24 = vpack.c.bf16 %v535_v21, %v534_v20  ;;  %v537_v27 = vld [vmem:[#allocation10 + $0x38] sm:$0xff]  ;;  %v447_v28 = vld [vmem:[#allocation9 + $0x50] sm:$0xff]  ;;  %p1398_p10 = pnand %p1397_p6, %p1942_p13  ;;  %s1400_s17 = sshll.u32 %s1506_s27, 4  ;;  %s1401_s17 = int_to_ptr.vmem [resolvable:$false] %s1400_s17 }
  0xbd   : > { %1096 = vmatprep.subr.bf16.mxu1 %v1503_v0  ;;  %v1082_v25 = vpack.c.bf16 %v446_v23, %v445_v22  ;;  %v448_v29 = vld [vmem:[#allocation9 + $0x58] sm:$0xff]  ;;  %v1103_v30 = vpack.c.bf16 %v537_v27, %v536_v26  ;;  %v538_v32 = vld [vmem:[#allocation10 + $0x40] sm:$0xff]  ;;  %v539_v33 = vld [vmem:[#allocation10 + $0x48] sm:$0xff]  ;;  %s1402_s21 = scalar_lea.vmem %s1401_s17, 256  ;;  %p1403_p8 = scmp.lt.s32.totalorder %s1835_s7, %s1401_s17 }
  0xbe   : > { %1074 = vmatpush3.bf16.msra.mxu0 %v1073_v7  ;;  %v1085_v31 = vpack.c.bf16 %v448_v29, %v447_v28  ;;  %v449_v34 = vld [vmem:[#allocation9 + $0x60] sm:$0xff]  ;;  %v450_v35 = vld [vmem:[#allocation9 + $0x68] sm:$0xff]  ;;  %v1106_v36 = vpack.c.bf16 %v539_v33, %v538_v32  ;;  %v540_v38 = vld [vmem:[#allocation10 + $0x50] sm:$0xff]  ;;  %s1833_s19 = scalar_lea.hbm %s1941_s18, %s926_s13  ;;  %p1399_p7 = pneg %p1398_p10 }
  0xbf   : > { %1075 = vmatprep.subr.bf16.mxu0 %v1503_v0  ;;  %v1088_v37 = vpack.c.bf16 %v450_v35, %v449_v34  ;;  %v541_v39 = vld [vmem:[#allocation10 + $0x58] sm:$0xff]  ;;  %v451_v40 = vld [vmem:[#allocation9 + $0x70] sm:$0xff]  ;;  %v542_v46 = vld [vmem:[#allocation10 + $0x60] sm:$0xff]  ;;  %p1404_p11 = scmp.lt.s32.totalorder %s1402_s21, %s1396_s10 }
  0xc0   : > { %1098 = vmatpush3.bf16.msra.mxu1 %v1097_v18  ;;  %v452_v41 = vld [vmem:[#allocation9 + $0x78] sm:$0xff]  ;;  %v643_v42 = vld [vmem:[#allocation6 + $0x80] sm:$0xff]  ;;  %v1109_v44 = vpack.c.bf16 %v541_v39, %v540_v38  ;;  %v543_v47 = vld [vmem:[#allocation10 + $0x68] sm:$0xff] }
  0xc1   : > { %1099 = vmatprep.subr.bf16.mxu1 %v1503_v0  ;;  %v644_v43 = vld [vmem:[#allocation6 + $0x88] sm:$0xff]  ;;  %v1091_v45 = vpack.c.bf16 %v452_v41, %v451_v40  ;;  %v627_v49 = vld [vmem:[#allocation6] sm:$0xff]  ;;  %v645_v51 = vld [vmem:[#allocation6 + $0x90] sm:$0xff]  ;;  %v1112_v53 = vpack.c.bf16 %v543_v47, %v542_v46  ;;  %p1405_p1 = por %p1404_p11, %p1403_p8 }
  0xc2   : > { %1077 = vmatpush3.bf16.msra.mxu0 %v1076_v10  ;;  %v1117_v48 = vpack.c.bf16 %v644_v43, %v643_v42  ;;  %v628_v50 = vld [vmem:[#allocation6 + $0x8] sm:$0xff]  ;;  %v646_v52 = vld [vmem:[#allocation6 + $0x98] sm:$0xff]  ;;  %v629_v57 = vld [vmem:[#allocation6 + $0x10] sm:$0xff] }
  0xc3   : > { %1078 = vmatprep.subr.bf16.mxu0 %v1503_v0  ;;  %v436_v54 = vld [vmem:[%s1788_s23] sm:$0xff]  ;;  %v1119_v55 = vpack.c.bf16 %v628_v50, %v627_v49  ;;  %v1121_v56 = vpack.c.bf16 %v646_v52, %v645_v51  ;;  %v630_v58 = vld [vmem:[#allocation6 + $0x18] sm:$0xff]  ;;  %v649_v2 = vld [vmem:[#allocation6 + $0xb0] sm:$0xff]  ;;  %p1406_p12 = pnand %p1405_p1, %p1399_p7 }
  0xc4   : > { %1101 = vmatpush3.bf16.msra.mxu1 %v1100_v24  ;;  %v647_v59 = vld [vmem:[#allocation6 + $0xa0] sm:$0xff]  ;;  %v648_v60 = vld [vmem:[#allocation6 + $0xa8] sm:$0xff]  ;;  %v1123_v61 = vpack.c.bf16 %v630_v58, %v629_v57  ;;  %v650_v3 = vld [vmem:[#allocation6 + $0xb8] sm:$0xff] }
  0xc5   : > { %1102 = vmatprep.subr.bf16.mxu1 %v1503_v0  ;;  %v1125_v62 = vpack.c.bf16 %v648_v60, %v647_v59  ;;  %v631_v63 = vld [vmem:[#allocation6 + $0x20] sm:$0xff]  ;;  %v632_v1 = vld [vmem:[#allocation6 + $0x28] sm:$0xff]  ;;  %v1129_v5 = vpack.c.bf16 %v650_v3, %v649_v2  ;;  %v633_v6 = vld [vmem:[#allocation6 + $0x30] sm:$0xff] }
  0xc6   : > { %1080 = vmatpush3.bf16.msra.mxu0 %v1079_v19  ;;  %v1127_v4 = vpack.c.bf16 %v632_v1, %v631_v63  ;;  %v634_v7 = vld [vmem:[#allocation6 + $0x38] sm:$0xff]  ;;  %v651_v8 = vld [vmem:[#allocation6 + $0xc0] sm:$0xff]  ;;  %v652_v9 = vld [vmem:[#allocation6 + $0xc8] sm:$0xff] }
  0xc7   : > { %1081 = vmatprep.subr.bf16.mxu0 %v1503_v0  ;;  %v1131_v10 = vpack.c.bf16 %v634_v7, %v633_v6  ;;  %v1133_v11 = vpack.c.bf16 %v652_v9, %v651_v8  ;;  %v635_v12 = vld [vmem:[#allocation6 + $0x40] sm:$0xff]  ;;  %v653_v13 = vld [vmem:[#allocation6 + $0xd0] sm:$0xff]  ;;  %v654_v14 = vld [vmem:[#allocation6 + $0xd8] sm:$0xff] }
  0xc8   : > { %1104 = vmatpush3.bf16.msra.mxu1 %v1103_v30  ;;  %v1137_v16 = vpack.c.bf16 %v654_v14, %v653_v13  ;;  %v637_v17 = vld [vmem:[#allocation6 + $0x50] sm:$0xff]  ;;  %v638_v18 = vld [vmem:[#allocation6 + $0x58] sm:$0xff]  ;;  %v655_v19 = vld [vmem:[#allocation6 + $0xe0] sm:$0xff] }
  0xc9   : > { %1105 = vmatprep.subr.bf16.mxu1 %v1503_v0  ;;  %v656_v20 = vld [vmem:[#allocation6 + $0xe8] sm:$0xff]  ;;  %v1139_v21 = vpack.c.bf16 %v638_v18, %v637_v17  ;;  %v639_v23 = vld [vmem:[#allocation6 + $0x60] sm:$0xff]  ;;  %v658_v26 = vld [vmem:[#allocation6 + $0xf8] sm:$0xff] }
  0xca   : > { %1083 = vmatpush3.bf16.msra.mxu0 %v1082_v25  ;;  %v1141_v22 = vpack.c.bf16 %v656_v20, %v655_v19  ;;  %v640_v24 = vld [vmem:[#allocation6 + $0x68] sm:$0xff]  ;;  %v657_v25 = vld [vmem:[#allocation6 + $0xf0] sm:$0xff]  ;;  %v642_v30 = vld [vmem:[#allocation6 + $0x78] sm:$0xff] }
  0xcb   : > { %1084 = vmatprep.subr.bf16.mxu0 %v1503_v0  ;;  %v1143_v27 = vpack.c.bf16 %v640_v24, %v639_v23  ;;  %v1145_v28 = vpack.c.bf16 %v658_v26, %v657_v25  ;;  %v641_v29 = vld [vmem:[#allocation6 + $0x70] sm:$0xff]  ;;  %v544_v32 = vld [vmem:[#allocation10 + $0x70] sm:$0xff]  ;;  %v545_v33 = vld [vmem:[#allocation10 + $0x78] sm:$0xff] }
  0xcc   : > { %1107 = vmatpush3.bf16.msra.mxu1 %v1106_v36  ;;  %v1115_v34 = vpack.c.bf16 %v545_v33, %v544_v32  ;;  %v626_v35 = vld [vmem:[%s1775_s15 + $0x8] sm:$0xff]  ;;  %v625_v36 = vld [vmem:[%s1775_s15] sm:$0xff] }
  0xcd   : > { %1108 = vmatprep.subr.bf16.mxu1 %v1503_v0 }
  0xce   : > { %1086 = vmatpush3.bf16.msra.mxu0 %v1085_v31  ;;  %v1147_v31 = vpack.c.bf16 %v642_v30, %v641_v29 }
  0xcf   : > { %1087 = vmatprep.subr.bf16.mxu0 %v1503_v0 }
  0xd0   : > { %1110 = vmatpush3.bf16.msra.mxu1 %v1109_v44  ;;  %v924_v44 = vld [vmem:[%s1884_s2] ss:$0 sm:$0xff] }
  0xd1   : > { %1111 = vmatprep.subr.bf16.mxu1 %v1503_v0 }
  0xd2   : > { %1089 = vmatpush3.bf16.msra.mxu0 %v1088_v37  ;;  %v923_v37 = vld [vmem:[%s1887_s5] ss:$0 sm:$0xff] }
  0xd3   : > { %1090 = vmatprep.subr.bf16.mxu0 %v1503_v0 }
  0xd4   : > { %1113 = vmatpush3.bf16.msra.mxu1 %v1112_v53 }
  0xd5   : > { %1114 = vmatprep.subr.bf16.mxu1 %v1503_v0  ;;  %v636_v0 = vld [vmem:[#allocation6 + $0x48] sm:$0xff] }
  0xd6   : > { %1092 = vmatpush3.bf16.msra.mxu0 %v1091_v45  ;;  %v1135_v15 = vpack.c.bf16 %v636_v0, %v635_v12 }
  0xd7   : > { %1118 = vmatprep.subr.bf16.mxu0 %v1117_v48 }
  0xd8   : > { %1116 = vmatpush3.bf16.msra.mxu1 %v1115_v34 }
  0xd9   : > { %1032 = vmatmul.mubr.f32.vlgmr.msra.gmra.mrb[0].mxu0 %v436_v54 }
  0xda   : > { %1120 = vmatpush3.bf16.msra.mxu0 %v1119_v55  ;;  %723 = vmatprep.mubr.f32.mxu0 %v626_v35 }
  0xdb   : > { %1122 = vmatprep.subr.bf16.mxu0 %v1121_v56 }
  0xde   : > { %1124 = vmatpush3.bf16.msra.mxu0 %v1123_v61 }
  0xdf   : > { %1126 = vmatprep.subr.bf16.mxu0 %v1125_v62 }
  0xe2   : > { %1128 = vmatpush3.bf16.msra.mxu0 %v1127_v4 }
  0xe3   : > { %1130 = vmatprep.subr.bf16.mxu0 %v1129_v5 }
  0xe6   : > { %1132 = vmatpush3.bf16.msra.mxu0 %v1131_v10 }
  0xe7   : > { %1134 = vmatprep.subr.bf16.mxu0 %v1133_v11 }
  0xea   : > { %1136 = vmatpush3.bf16.msra.mxu0 %v1135_v15 }
  0xeb   : > { %1138 = vmatprep.subr.bf16.mxu0 %v1137_v16 }
  0xee   : > { %1140 = vmatpush3.bf16.msra.mxu0 %v1139_v21 }
  0xef   : > { %1142 = vmatprep.subr.bf16.mxu0 %v1141_v22 }
  0xf2   : > { %1144 = vmatpush3.bf16.msra.mxu0 %v1143_v27 }
  0xf3   : > { %1146 = vmatprep.subr.bf16.mxu0 %v1145_v28 }
  0xf6   : > { %1148 = vmatpush3.bf16.msra.mxu0 %v1147_v31 }
  0xf9   : > { %724 = vmatmul.mubr.f32.vlgmr.msra.gmra.mrb[2].mxu0 %v625_v36 }
 0x1ac   : > { %v526_v38 = vpop.f32.mrb[0].mxu0 }
 0x1ad   : > { %v527_v39 = vadd.f32 %v923_v37, %v526_v38  ;;  %v1033_v40 = vpop.f32.mrb[1].mxu0 }
 0x1af   : > { %1067 = vmatmul.mubr.f32.vlgmr.msra.gmra.mrb[0].mxu1 %v527_v39 }
 0x1cc   : > { %v996_v41 = vpop.f32.mrb[2].mxu0 }
 0x1cd   : > { %v997_v42 = vpop.f32.mrb[3].mxu0 }
 0x1ce   : > { %v998_v43 = vadd.f32 %v997_v42, %v996_v41 }
 0x282   : > { %v619_v45 = vpop.f32.mrb[0].mxu1 }
 0x283   : > { %v620_v46 = vadd.f32 %v924_v44, %v619_v45  ;;  %v1068_v47 = vpop.f32.mrb[1].mxu1 }
 0x285   : > { %v729_v48 = vadd.f32 %v998_v43, %v620_v46 }
 0x287   : > { %735 = vst [vmem:[%s426_s14] sm:$0xff] %v729_v48 }
 0x288   : > { %1409 = shalt.err (!%p1406_p12)
}
 0x289   : > { %s1410_s12 = scalar_lea.hbm %s1833_s19, 128  ;;  %s1414_s15 = scalar_lea.hbm %s1941_s18, 256 }
 0x28a   : > { %p1411_p3 = scmp.ne.s32.totalorder %s1833_s19, %s1410_s12  ;;  %p1415_p9 = scmp.lt.u32.totalorder %s1833_s19, %s1941_s18 }
 0x28b   : > { %p1416_p2 = scmp.lt.u32.totalorder %s1414_s15, %s1410_s12  ;;  %p1418_p6 = scmp.lt.u32.totalorder %s1410_s12, %s1833_s19 }
 0x28c   : > { %p1412_p0 = pnand %p1411_p3, %p1942_p13 }
 0x28d   : > { %p1417_p4 = por %p1416_p2, %p1415_p9 }
 0x28e   : > { %p1413_p5 = pneg %p1412_p0 }
 0x28f   : > { %p1419_p10 = por %p1418_p6, %p1417_p4 }
 0x291   : > { %p1420_p7 = pnand %p1419_p10, %p1413_p5 }
 0x293   : > { %1423 = shalt.err (!%p1420_p7)
}
 0x294   : > { %1165 = dma.vmem_to_hbm [thread:$0]  (%p1942_p13), %s1835_s7, 128, %s1833_s19, %s737_s0  }
 0x295 PF: > { %s1943_s30 = sld [smem:[#allocation19_spill]]  ;;  %s1944_s9 = sld [smem:[#allocation21_spill]] }
 0x296   : > { %p1946_p11 = scmp.ge.s32.totalorder %s1494_s29, 2 }
 0x29b   : > { %s763_s1 = sand.u32 1, %s1943_s30   ;;  %p1945_p8 = scmp.ne.s32.totalorder %s1944_s9, 0 }
 0x29c   : > { %s764_s20 = scalar_lea.sflag [#allocation5], %s763_s1 }
 0x29d   : > { %p1185_p1 = pnand %p1946_p11, %p1945_p8 }
 0x29f   : > { %1469 = dma.done.wait (!%p1185_p1), %s764_s20, 128  }
 0x2a0   : > { %1471 = vsyncadd (!%p1185_p1), %s764_s20, 4294967168  ;;  %s25_s29 = sadd.s32 1, %s1494_s29   ;;  %s1947_s13 = sld [smem:[#allocation20_spill]] }
 0x2a1   : > { %p22_p12 = scmp.ge.s32.totalorder %s25_s29, 4   ;;  %s1948_s26 = sld [smem:[#allocation23_spill]] }
 0x2a2   : > { %s1949_s22 = sld [smem:[#allocation22_spill]]  ;;  %s1950_s24 = smov %s1478_s25 }
 0x2a3   : > { %s1952_s27 = smov %s1490_s28  ;;  %24 = sbr.rel (!%p22_p12) target bundleno = 12 (0xc), region = 129 }
 0x2a6   : > { %s1951_s25 = smov %s1947_s13 }
 0x2a8   : > { %s1953_s28 = smov %s1949_s22 }
 0x2aa   :  { %769 = vsyncpa [#allocation4], 1 }
 0x2ab   :  { %771 = vsyncpa [#allocation4 + $0x1], 1 }
 0x2ac   :  { %772 = vsyncpa [#allocation7], 1 }
 0x2ad   :  { %773 = vsyncpa [#allocation11], 1 }
 0x2ae   :  { %774 = vsyncpa [#allocation5], 1 }
 0x2af   :  { %776 = vsyncpa [#allocation5 + $0x1], 1 }

</bundles_post_ra>
